<compile_context>
chip_gen: v7x
topology: tpu7x:2x2x1
jax: 0.10.0
libtpu: 0.0.40
codegen_flags: <defaults>
</compile_context>

<pallas_src>
import functools

import jax
import jax.numpy as jnp
from jax.experimental import pallas as pl
from jax.experimental.pallas import tpu as pltpu


def _round_up(x, m):
    return (x + m - 1) // m * m


def fm_kernel(idx_t_ref, lhs_t_ref, out_ref, *, emb_dim):
    # idx_t_ref : [F, n_blk]     int32, offset-adjusted indices (batch on lanes)
    # lhs_t_ref : [d_pad, v_pad] f32 fused operand:
    #               rows 0..D-1  = table^T
    #               rows D..2D-1 = -(table*table)^T
    #               row  2D      = w^T            (remaining rows are zero pad)
    # out_ref   : [1, n_blk]     f32, sigmoid(linear + fm)
    F, n_blk = idx_t_ref.shape
    d_pad, v_pad = lhs_t_ref.shape

    idx_all = idx_t_ref[...]                                          # one load
    iota_v = jax.lax.broadcasted_iota(jnp.int32, (v_pad, n_blk), 0)   # hoisted

    # Disjoint per-field one-hots OR'd into one multi-hot, single cast at the
    # end (fields occupy disjoint vocab ranges after the offsets).
    hit = iota_v == idx_all[0:1, :]
    for f in range(1, F):                      # F is small and static
        hit = hit | (iota_v == idx_all[f:f + 1, :])
    counts = hit.astype(jnp.float32)           # [v_pad, n_blk]

    # Single MXU matmul gathers everything at once:
    #   rows < D      : s_d[n]   = sum_f table[idx(n,f), d]
    #   D <= row < 2D : -sum_f table[idx(n,f), d]^2
    #   row == 2D     : y_linear[n]              (pad rows stay exactly zero)
    res = jnp.dot(lhs_t_ref[...], counts, preferred_element_type=jnp.float32)

    # rows < D get squared (square_of_sum); the rest are summed as-is.
    row_id = jax.lax.broadcasted_iota(jnp.int32, (d_pad, n_blk), 0)
    contrib = jnp.where(row_id < emb_dim, res * res, res)
    logit = jnp.sum(contrib, axis=0, keepdims=True)       # [1, n_blk], lane-dense
    out_ref[...] = jax.nn.sigmoid(logit)


def fm_model_forward(x_raw, field_features, table, w, *, n_blk=256):
    """x_raw: [N, F] int32 raw per-field indices (0 <= x_raw[:, i] < field_features[i]).

    n_blk=256 fills the 256-wide MXU on v6e/v7x; on v5e 128 already fills the
    MXU and 256 only amortizes per-grid-step overhead.
    """
    N, F = x_raw.shape
    V, D = table.shape

    # offset each field into the shared vocab (mirrors the torch python loop)
    offsets = jnp.concatenate(
        [jnp.zeros((1,), jnp.int32),
         jnp.cumsum(jnp.asarray(field_features, jnp.int32))[:-1]])
    idx = x_raw.astype(jnp.int32) + offsets[None, :]       # [N, F]

    n_pad = _round_up(N, n_blk)
    v_pad = _round_up(V, 128)            # lane dim of the resident LHS
    d_rows = 2 * D + 1                   # table / -(table^2) / w stacked
    d_pad = _round_up(d_rows, 8)         # sublane dim only needs 8-alignment

    # batch on lanes: pad to a multiple of n_blk (pad index 0 is a valid row,
    # its output columns are discarded below)
    idx_t = jnp.pad(idx, ((0, n_pad - N), (0, 0))).T       # [F, n_pad]

    # fused, padded LHS built directly in transposed [d_pad, v_pad] layout
    lhs_t = (jnp.zeros((d_pad, v_pad), jnp.float32)
             .at[:D, :V].set(table.T)
             .at[D:2 * D, :V].set(-(table * table).T)
             .at[2 * D, :V].set(w[:, 0]))

    # resident LHS (double-buffered by the pipeline) + idx/out tiles
    # (double-buffered) + in-kernel counts / result temps, plus headroom.
    vmem_bytes = int(
        4 * (2 * d_pad * v_pad          # fused resident table
             + 2 * F * n_blk            # idx tile (int32)
             + 2 * 1 * n_blk            # output tile
             + v_pad * n_blk            # counts temp
             + 2 * d_pad * n_blk)       # matmul result + contrib temps
        + (4 << 20))                    # compiler-internal headroom

    out = pl.pallas_call(
        functools.partial(fm_kernel, emb_dim=D),
        out_shape=jax.ShapeDtypeStruct((1, n_pad), jnp.float32),
        grid=(n_pad // n_blk,),
        in_specs=[
            pl.BlockSpec((F, n_blk), lambda i: (0, i)),       # idx tile per block
            pl.BlockSpec((d_pad, v_pad), lambda i: (0, 0)),   # fused table, resident
        ],
        out_specs=pl.BlockSpec((1, n_blk), lambda i: (0, i)), # lane-dense output
        compiler_params=pltpu.CompilerParams(
            dimension_semantics=("parallel",),
            vmem_limit_bytes=vmem_bytes),
    )(idx_t, lhs_t)

    return out[0, :N].reshape(N, 1)


def fm_model_reference(x_raw, field_features, table, w):
    offsets = jnp.concatenate(
        [jnp.zeros((1,), jnp.int32),
         jnp.cumsum(jnp.asarray(field_features, jnp.int32))[:-1]])
    idx = x_raw.astype(jnp.int32) + offsets[None, :]        # [N, F]
    emb = table[idx]                                        # [N, F, D]
    lin = w[idx]                                            # [N, F, 1]
    square_of_sum = jnp.sum(emb, axis=1) ** 2
    sum_of_square = jnp.sum(emb ** 2, axis=1)
    y_fm = jnp.sum(square_of_sum - sum_of_square, axis=1, keepdims=True)
    y_lin = jnp.sum(lin, axis=1)
    return jax.nn.sigmoid(y_lin + y_fm)


if __name__ == "__main__":
    # small, deterministic configuration
    field_features = (10, 20, 15, 8, 12, 6)   # F = 6 fields, V = 71
    vector_dim = 32
    N = 8
    F = len(field_features)
    V = int(sum(field_features))

    key = jax.random.PRNGKey(0)
    k_tab, k_w, k_x = jax.random.split(key, 3)

    # nn.Embedding default init ~ N(0, 1)
    table = jax.random.normal(k_tab, (V, vector_dim), dtype=jnp.float32)
    w = jax.random.normal(k_w, (V, 1), dtype=jnp.float32)

    # raw per-field indices
    maxvals = jnp.asarray(field_features, jnp.int32)
    u = jax.random.uniform(k_x, (N, F))
    x_raw = jnp.floor(u * maxvals[None, :].astype(jnp.float32)).astype(jnp.int32)

    out = fm_model_forward(x_raw, field_features, table, w)
    out = jax.block_until_ready(out)

    ref = fm_model_reference(x_raw, field_features, table, w)
    assert out.shape == (N, 1)
    assert jnp.allclose(out, ref, rtol=1e-4, atol=1e-5), (out, ref)

    # TODO(synk): get_Item_vector (torch.unique on self.item) and the
    # `self.item = x[:, -3:]` side effect have no clean Pallas equivalent;
    # only the forward pass is implemented here.
    print("KERNEL_OK")
</pallas_src>

<mosaic_0001>
module attributes {stable_mosaic.version = 11 : i64} {
  func.func @fm_kernel(%arg0: i32, %arg1: memref<6x256xi32, #tpu.memory_space<vmem>>, %arg2: memref<72x128xf32, #tpu.memory_space<vmem>>, %arg3: memref<1x256xf32, #tpu.memory_space<vmem>>) attributes {dimension_semantics = [#tpu.dimension_semantics<parallel>], iteration_bounds = array<i64: 1>, scalar_prefetch = 0 : i64, scratch_operands = 0 : i64, tpu.core_type = #tpu.core_type<tc>, window_params = [{transform_indices = @transform_0, window_bounds = array<i64: 6, 256>}, {pipeline_mode = #tpu.pipeline_mode<synchronous>, transform_indices = @transform_1, window_bounds = array<i64: 72, 128>}, {transform_indices = @transform_2, window_bounds = array<i64: 1, 256>}]} {
    %c0 = arith.constant 0 : index
    %c0_0 = arith.constant 0 : index
    %0 = vector.load %arg1[%c0, %c0_0] : memref<6x256xi32, #tpu.memory_space<vmem>>, vector<6x256xi32>
    %1 = tpu.iota {dimensions = array<i32: 0>} : vector<128x256xi32>
    %2 = vector.extract_strided_slice %0 {offsets = [0, 0], sizes = [1, 256], strides = [1, 1]} : vector<6x256xi32> to vector<1x256xi32>
    %3 = vector.broadcast %2 : vector<1x256xi32> to vector<128x256xi32>
    %4 = arith.cmpi eq, %1, %3 : vector<128x256xi32>
    %5 = vector.extract_strided_slice %0 {offsets = [1, 0], sizes = [1, 256], strides = [1, 1]} : vector<6x256xi32> to vector<1x256xi32>
    %6 = vector.broadcast %5 : vector<1x256xi32> to vector<128x256xi32>
    %7 = arith.cmpi eq, %1, %6 : vector<128x256xi32>
    %8 = arith.ori %4, %7 : vector<128x256xi1>
    %9 = vector.extract_strided_slice %0 {offsets = [2, 0], sizes = [1, 256], strides = [1, 1]} : vector<6x256xi32> to vector<1x256xi32>
    %10 = vector.broadcast %9 : vector<1x256xi32> to vector<128x256xi32>
    %11 = arith.cmpi eq, %1, %10 : vector<128x256xi32>
    %12 = arith.ori %8, %11 : vector<128x256xi1>
    %13 = vector.extract_strided_slice %0 {offsets = [3, 0], sizes = [1, 256], strides = [1, 1]} : vector<6x256xi32> to vector<1x256xi32>
    %14 = vector.broadcast %13 : vector<1x256xi32> to vector<128x256xi32>
    %15 = arith.cmpi eq, %1, %14 : vector<128x256xi32>
    %16 = arith.ori %12, %15 : vector<128x256xi1>
    %17 = vector.extract_strided_slice %0 {offsets = [4, 0], sizes = [1, 256], strides = [1, 1]} : vector<6x256xi32> to vector<1x256xi32>
    %18 = vector.broadcast %17 : vector<1x256xi32> to vector<128x256xi32>
    %19 = arith.cmpi eq, %1, %18 : vector<128x256xi32>
    %20 = arith.ori %16, %19 : vector<128x256xi1>
    %21 = vector.extract_strided_slice %0 {offsets = [5, 0], sizes = [1, 256], strides = [1, 1]} : vector<6x256xi32> to vector<1x256xi32>
    %22 = vector.broadcast %21 : vector<1x256xi32> to vector<128x256xi32>
    %23 = arith.cmpi eq, %1, %22 : vector<128x256xi32>
    %24 = arith.ori %20, %23 : vector<128x256xi1>
    %25 = arith.extui %24 : vector<128x256xi1> to vector<128x256xi32>
    %26 = arith.sitofp %25 : vector<128x256xi32> to vector<128x256xf32>
    %c0_1 = arith.constant 0 : index
    %c0_2 = arith.constant 0 : index
    %27 = vector.load %arg2[%c0_1, %c0_2] : memref<72x128xf32, #tpu.memory_space<vmem>>, vector<72x128xf32>
    %cst = arith.constant dense<0.000000e+00> : vector<72x256xf32>
    %28 = tpu.matmul %27, %26, %cst {dimension_numbers = #tpu.dot_dimension_numbers<[1], [0], [0], [1], [0, 0, 1, 1], [], []>} : vector<72x128xf32>, vector<128x256xf32>, vector<72x256xf32> -> vector<72x256xf32>
    %29 = tpu.iota {dimensions = array<i32: 0>} : vector<72x256xi32>
    %c32_i32 = arith.constant 32 : i32
    %30 = vector.broadcast %c32_i32 : i32 to vector<72x256xi32>
    %31 = arith.cmpi slt, %29, %30 : vector<72x256xi32>
    %32 = arith.mulf %28, %28 : vector<72x256xf32>
    %33 = arith.select %31, %32, %28 : vector<72x256xi1>, vector<72x256xf32>
    %cst_3 = arith.constant dense<0.000000e+00> : vector<256xf32>
    %34 = vector.multi_reduction <add>, %33, %cst_3 [0] : vector<72x256xf32> to vector<256xf32>
    %35 = vector.shape_cast %34 : vector<256xf32> to vector<1x256xf32>
    %36 = arith.negf %35 : vector<1x256xf32>
    %37 = math.exp %36 : vector<1x256xf32>
    %cst_4 = arith.constant 1.000000e+00 : f32
    %38 = vector.broadcast %cst_4 : f32 to vector<1x256xf32>
    %39 = arith.addf %38, %37 : vector<1x256xf32>
    %40 = arith.divf %38, %39 : vector<1x256xf32>
    %c0_5 = arith.constant 0 : index
    %c0_6 = arith.constant 0 : index
    %41 = vector.load %arg3[%c0_5, %c0_6] : memref<1x256xf32, #tpu.memory_space<vmem>>, vector<1x256xf32>
    tpu.vector_store %arg3[%c0_5, %c0_6], %40 {strides = array<i32>} : memref<1x256xf32, #tpu.memory_space<vmem>>, vector<1x256xf32>,
    return
  }
  func.func @transform_0(%arg0: i32) -> (i32, i32) {
    %c0_i32 = arith.constant 0 : i32
    %c0_i32_0 = arith.constant 0 : i32
    return %c0_i32, %arg0 : i32, i32
  }
  func.func @transform_1(%arg0: i32) -> (i32, i32) {
    %c0_i32 = arith.constant 0 : i32
    %c0_i32_0 = arith.constant 0 : i32
    %c0_i32_1 = arith.constant 0 : i32
    return %c0_i32, %c0_i32_0 : i32, i32
  }
  func.func @transform_2(%arg0: i32) -> (i32, i32) {
    %c0_i32 = arith.constant 0 : i32
    %c0_i32_0 = arith.constant 0 : i32
    return %c0_i32, %arg0 : i32, i32
  }
}

</mosaic_0001>

<bundles_post_ra>
// kernel: tpu_custom_call.1
= control target key start
LH: loop header
LB: loop body
LE: loop exit
PB: predicated region body
PF: predicated region fallthrough
CT: control target
= control target key end

     0   :  { %7 = vsyncpa [#allocation3], 0  ;;  %s1508_s0 = inlined_call_operand.hbm [shape: s32[6,256], index: 0, kind: input, shape index: {}]   ;;  %s1509_s1 = inlined_call_operand.hbm [shape: f32[72,128], index: 1, kind: input, shape index: {}]   ;;  %s1510_s2 = inlined_call_operand.hbm [shape: f32[1,256], index: 2, kind: output, shape index: {}]  }
   0x1   :  { %8 = vsyncpa [#allocation6], 0 }
   0x2   :  { %9 = vsyncpa [#allocation4], 0  ;;  %s952_s9 = smov [#allocation2]   ;;  %s953_s11 = smov [#allocation5]  }
   0x3   :  { %s16_s10 = sshll.u32 %s952_s9, 4  ;;  %s25_s12 = sshll.u32 %s953_s11, 4  ;;  %s17_s10 = int_to_ptr.vmem [resolvable:$true] %s16_s10  ;;  %s974_s12 = int_to_ptr.vmem [resolvable:$true] %s25_s12 }
   0x4   :  { %s880_s15 = scalar_lea.hbm %s1508_s0, 256 }
   0x5   :  { %p881_p0 = scmp.ne.s32.totalorder %s1508_s0, %s880_s15  ;;  %p884_p1 = scmp.lt.u32.totalorder %s880_s15, %s1508_s0 }
   0x7   :  { %p886_p2 = pnand %p884_p1, %p881_p0 }
   0x9   :  { %889 = shalt.err (!%p886_p2)
}
   0xa   :  { %s890_s20 = scalar_lea.vmem %s17_s10, 256  ;;  %p895_p4 = scmp.lt.s32.totalorder %s17_s10, %s17_s10 }
   0xb   :  { %p891_p3 = scmp.ne.s32.totalorder %s17_s10, %s890_s20  ;;  %p896_p5 = scmp.lt.s32.totalorder %s890_s20, %s890_s20 }
   0xd   :  { %p897_p6 = por %p896_p5, %p895_p4 }
   0xf   :  { %p898_p7 = pnand %p897_p6, %p891_p3 }
  0x11   :  { %901 = shalt.err (!%p898_p7)
}
  0x12   :  { %19 = dma.hbm_to_vmem [thread:$0]  %s1508_s0, 256, %s17_s10, [#allocation3]  }
  0x13   :  { %s902_s25 = scalar_lea.hbm %s1509_s1, 1152 }
  0x14   :  { %p903_p8 = scmp.ne.s32.totalorder %s1509_s1, %s902_s25  ;;  %p906_p9 = scmp.lt.u32.totalorder %s902_s25, %s1509_s1 }
  0x16   :  { %p908_p10 = pnand %p906_p9, %p903_p8 }
  0x18   :  { %911 = shalt.err (!%p908_p10)
}
  0x19   :  { %s912_s30 = scalar_lea.vmem %s974_s12, 1152  ;;  %p917_p12 = scmp.lt.s32.totalorder %s974_s12, %s974_s12 }
  0x1a   :  { %p913_p11 = scmp.ne.s32.totalorder %s974_s12, %s912_s30  ;;  %p918_p13 = scmp.lt.s32.totalorder %s912_s30, %s912_s30 }
  0x1c   :  { %p919_p0 = por %p918_p13, %p917_p12 }
  0x1e   :  { %p920_p1 = pnand %p919_p0, %p913_p11 }
  0x20   :  { %923 = shalt.err (!%p920_p1)
}
  0x21   :  { %s954_s0 = smov 128   ;;  %s955_s3 = smov 8  }
  0x22   :  { %31 = dma.hbm_to_vmem [thread:$0]  %s1509_s1, 1152, %s974_s12, [#allocation6], %s954_s0, %s954_s0, %s955_s3  }
  0x23   :  { %946 = dma.done.wait [#allocation3], 256  }
  0x24   :  { %947 = vsyncadd [#allocation3], 4294967040 }
  0x25   :  { %948 = dma.done.wait [#allocation6], 1152  }
  0x26   :  { %949 = vsyncadd [#allocation6], 4294966144  ;;  %v40_v0 = vlaneseq  ;;  %v956_v1 = vmov 0.0   ;;  %v39_v9 = vld [vmem:[#allocation2 + $0x8] sm:$0x3f]  ;;  %s958_s1 = smov [#allocation7]  }
  0x27   :  { %594 = vmatprep.mubr.f32.mxu0 %v956_v1  ;;  %624 = vmatprep.mubr.f32.mxu1 %v956_v1  ;;  %v38_v16 = vld [vmem:[#allocation2] sm:$0x3f]  ;;  %s763_s6 = sshll.u32 %s958_s1, 4  ;;  %s764_s6 = int_to_ptr.vmem [resolvable:$true] %s763_s6 }
  0x28   :  { %v1008_v2 = vshrl.u32 %v40_v0, 7  ;;  %s924_s7 = scalar_lea.vmem %s764_s6, 32  ;;  %p929_p3 = scmp.lt.s32.totalorder %s764_s6, %s764_s6 }
  0x29   :  { %p925_p2 = scmp.ne.s32.totalorder %s764_s6, %s924_s7  ;;  %p930_p4 = scmp.lt.s32.totalorder %s924_s7, %s924_s7 }
  0x2a   :  { %v59_v3 = vsub.s32 0, %v1008_v2  ;;  %v99_v4 = vsub.s32 1, %v1008_v2  ;;  %v171_v5 = vsub.s32 2, %v1008_v2  ;;  %v243_v6 = vsub.s32 3, %v1008_v2 }
  0x2b   :  { %v315_v7 = vsub.s32 4, %v1008_v2  ;;  %v1016_v8 = vadd.s32 8, %v1008_v2  ;;  %v387_v10 = vsub.s32 5, %v1008_v2  ;;  %v1088_v27 = vadd.s32 16, %v1008_v2  ;;  %p931_p5 = por %p930_p4, %p929_p3 }
  0x2c   :  { %v1019_v11 = vrot.slane %v39_v9, %v59_v3  ;;  %v1021_v12 = vrot.slane %v39_v9, %v99_v4  ;;  %v1023_v13 = vrot.slane %v39_v9, %v171_v5  ;;  %v1025_v14 = vrot.slane %v39_v9, %v243_v6 }
  0x2d   :  { %v1027_v15 = vrot.slane %v39_v9, %v315_v7  ;;  %v1043_v17 = vrot.slane %v39_v9, %v387_v10  ;;  %v1049_v18 = vrot.slane %v38_v16, %v59_v3  ;;  %v1051_v19 = vrot.slane %v38_v16, %v99_v4  ;;  %p932_p6 = pnand %p931_p5, %p925_p2 }
  0x2e   :  { %vm66_vm0 = vcmp.eq.s32.totalorder %v1008_v2, %v1019_v11  ;;  %vm68_vm1 = vcmp.eq.s32.totalorder %v1016_v8, %v1019_v11  ;;  %vm106_vm2 = vcmp.eq.s32.totalorder %v1008_v2, %v1021_v12  ;;  %vm108_vm3 = vcmp.eq.s32.totalorder %v1016_v8, %v1021_v12 }
  0x2f   :  { %vm138_vm4 = vmor %vm66_vm0, %vm106_vm2  ;;  %vm178_vm5 = vcmp.eq.s32.totalorder %v1008_v2, %v1023_v13  ;;  %vm180_vm6 = vcmp.eq.s32.totalorder %v1016_v8, %v1023_v13  ;;  %vm250_vm8 = vcmp.eq.s32.totalorder %v1008_v2, %v1025_v14  ;;  %vm252_vm10 = vcmp.eq.s32.totalorder %v1016_v8, %v1025_v14 }
  0x30   :  { %vm140_vm7 = vmor %vm68_vm1, %vm108_vm3  ;;  %vm322_vm12 = vcmp.eq.s32.totalorder %v1008_v2, %v1027_v15  ;;  %vm324_vm14 = vcmp.eq.s32.totalorder %v1016_v8, %v1027_v15  ;;  %vm394_vm0 = vcmp.eq.s32.totalorder %v1008_v2, %v1043_v17  ;;  %v1057_v20 = vrot.slane %v38_v16, %v171_v5 }
  0x31   :  { %vm210_vm9 = vmor %vm138_vm4, %vm178_vm5  ;;  %vm396_vm2 = vcmp.eq.s32.totalorder %v1016_v8, %v1043_v17  ;;  %vm65_vm4 = vcmp.eq.s32.totalorder %v1008_v2, %v1049_v18  ;;  %vm105_vm5 = vcmp.eq.s32.totalorder %v1008_v2, %v1051_v19  ;;  %v1065_v21 = vrot.slane %v38_v16, %v243_v6 }
  0x32   :  { %vm212_vm11 = vmor %vm140_vm7, %vm180_vm6  ;;  %vm67_vm7 = vcmp.eq.s32.totalorder %v1016_v8, %v1049_v18  ;;  %v1074_v23 = vrot.slane %v38_v16, %v315_v7  ;;  %v1081_v26 = vrot.slane %v38_v16, %v387_v10  ;;  %v1093_v28 = vadd.s32 24, %v1008_v2 }
  0x33   :  { %vm282_vm13 = vmor %vm210_vm9, %vm250_vm8  ;;  %vm107_vm8 = vcmp.eq.s32.totalorder %v1016_v8, %v1051_v19  ;;  %v1146_v35 = vadd.s32 32, %v1008_v2  ;;  %v1151_v36 = vadd.s32 40, %v1008_v2  ;;  %v1204_v43 = vadd.s32 48, %v1008_v2 }
  0x34   :  { %vm284_vm15 = vmor %vm212_vm11, %vm252_vm10  ;;  %vm177_vm10 = vcmp.eq.s32.totalorder %v1008_v2, %v1057_v20  ;;  %v1209_v44 = vadd.s32 56, %v1008_v2  ;;  %v1262_v51 = vadd.s32 64, %v1008_v2  ;;  %v1267_v52 = vadd.s32 72, %v1008_v2 }
  0x35   :  { %vm354_vm1 = vmor %vm282_vm13, %vm322_vm12  ;;  %vm179_vm12 = vcmp.eq.s32.totalorder %v1016_v8, %v1057_v20  ;;  %v1320_v59 = vadd.s32 80, %v1008_v2  ;;  %v1325_v60 = vadd.s32 88, %v1008_v2  ;;  %v1378_v6 = vadd.s32 96, %v1008_v2 }
  0x36   :  { %vm356_vm3 = vmor %vm284_vm15, %vm324_vm14  ;;  %vm249_vm14 = vcmp.eq.s32.totalorder %v1008_v2, %v1065_v21  ;;  %v1383_v7 = vadd.s32 104, %v1008_v2 }
  0x37   :  { %vm426_vm6 = vmor %vm354_vm1, %vm394_vm0  ;;  %vm251_vm0 = vcmp.eq.s32.totalorder %v1016_v8, %v1065_v21 }
  0x38   :  { %vm428_vm9 = vmor %vm356_vm3, %vm396_vm2  ;;  %v774_v22 = vsel %vm426_vm6, 1.0, %v956_v1  ;;  %vm321_vm2 = vcmp.eq.s32.totalorder %v1008_v2, %v1074_v23  ;;  %vm393_vm6 = vcmp.eq.s32.totalorder %v1008_v2, %v1081_v26 }
  0x39   :  { %v776_v24 = vsel %vm428_vm9, 1.0, %v956_v1  ;;  %vm137_vm11 = vmor %vm65_vm4, %vm105_vm5  ;;  %vm323_vm4 = vcmp.eq.s32.totalorder %v1016_v8, %v1074_v23 }
  0x3a   :  { %v807_v25 = vpack.c.bf16 %v776_v24, %v774_v22  ;;  %vm139_vm13 = vmor %vm67_vm7, %vm107_vm8  ;;  %vm395_vm8 = vcmp.eq.s32.totalorder %v1016_v8, %v1081_v26 }
  0x3b   :  { %vm209_vm15 = vmor %vm137_vm11, %vm177_vm10  ;;  %vm70_vm10 = vcmp.eq.s32.totalorder %v1088_v27, %v1019_v11  ;;  %vm110_vm11 = vcmp.eq.s32.totalorder %v1088_v27, %v1021_v12 }
  0x3c   :  { %808 = vmatprep.subr.bf16.mxu0 %v807_v25  ;;  %839 = vmatprep.subr.bf16.mxu1 %v807_v25  ;;  %vm211_vm1 = vmor %vm139_vm13, %vm179_vm12  ;;  %vm72_vm13 = vcmp.eq.s32.totalorder %v1093_v28, %v1019_v11  ;;  %v1436_v25 = vadd.s32 112, %v1008_v2 }
  0x3d   :  { %vm281_vm3 = vmor %vm209_vm15, %vm249_vm14  ;;  %vm112_vm14 = vcmp.eq.s32.totalorder %v1093_v28, %v1021_v12 }
  0x3e   :  { %vm283_vm5 = vmor %vm211_vm1, %vm251_vm0  ;;  %vm182_vm0 = vcmp.eq.s32.totalorder %v1088_v27, %v1023_v13 }
  0x3f   :  { %vm353_vm7 = vmor %vm281_vm3, %vm321_vm2  ;;  %vm184_vm2 = vcmp.eq.s32.totalorder %v1093_v28, %v1023_v13 }
  0x40   :  { %vm355_vm9 = vmor %vm283_vm5, %vm323_vm4  ;;  %vm254_vm4 = vcmp.eq.s32.totalorder %v1088_v27, %v1025_v14 }
  0x41   :  { %vm425_vm12 = vmor %vm353_vm7, %vm393_vm6  ;;  %vm256_vm6 = vcmp.eq.s32.totalorder %v1093_v28, %v1025_v14 }
  0x42   :  { %vm427_vm15 = vmor %vm355_vm9, %vm395_vm8  ;;  %v773_v29 = vsel %vm425_vm12, 1.0, %v956_v1  ;;  %vm326_vm8 = vcmp.eq.s32.totalorder %v1088_v27, %v1027_v15  ;;  %vm398_vm12 = vcmp.eq.s32.totalorder %v1088_v27, %v1043_v17 }
  0x43   :  { %v775_v30 = vsel %vm427_vm15, 1.0, %v956_v1  ;;  %vm142_vm1 = vmor %vm70_vm10, %vm110_vm11  ;;  %vm328_vm10 = vcmp.eq.s32.totalorder %v1093_v28, %v1027_v15 }
  0x44   :  { %v809_v31 = vpack.c.bf16 %v775_v30, %v773_v29  ;;  %vm144_vm3 = vmor %vm72_vm13, %vm112_vm14  ;;  %vm400_vm14 = vcmp.eq.s32.totalorder %v1093_v28, %v1043_v17 }
  0x45   :  { %vm214_vm5 = vmor %vm142_vm1, %vm182_vm0  ;;  %vm69_vm0 = vcmp.eq.s32.totalorder %v1088_v27, %v1049_v18  ;;  %vm109_vm1 = vcmp.eq.s32.totalorder %v1088_v27, %v1051_v19 }
  0x46   :  { %810 = vmatpush1.bf16.msra.mxu0 %v809_v31  ;;  %847 = vmatpush1.bf16.msra.mxu1 %v809_v31  ;;  %vm216_vm7 = vmor %vm144_vm3, %vm184_vm2  ;;  %vm71_vm3 = vcmp.eq.s32.totalorder %v1093_v28, %v1049_v18  ;;  %v528_v31 = vld [vmem:[#allocation5 + $0x38] sm:$0xff] }
  0x47   :  { %vm286_vm9 = vmor %vm214_vm5, %vm254_vm4  ;;  %vm111_vm4 = vcmp.eq.s32.totalorder %v1093_v28, %v1051_v19 }
  0x48   :  { %vm288_vm11 = vmor %vm216_vm7, %vm256_vm6  ;;  %vm181_vm6 = vcmp.eq.s32.totalorder %v1088_v27, %v1057_v20 }
  0x49   :  { %vm358_vm13 = vmor %vm286_vm9, %vm326_vm8  ;;  %vm183_vm8 = vcmp.eq.s32.totalorder %v1093_v28, %v1057_v20 }
  0x4a   :  { %vm360_vm15 = vmor %vm288_vm11, %vm328_vm10  ;;  %vm253_vm10 = vcmp.eq.s32.totalorder %v1088_v27, %v1065_v21 }
  0x4b   :  { %vm430_vm2 = vmor %vm358_vm13, %vm398_vm12  ;;  %vm255_vm12 = vcmp.eq.s32.totalorder %v1093_v28, %v1065_v21 }
  0x4c   :  { %vm432_vm5 = vmor %vm360_vm15, %vm400_vm14  ;;  %v778_v32 = vsel %vm430_vm2, 1.0, %v956_v1  ;;  %vm325_vm14 = vcmp.eq.s32.totalorder %v1088_v27, %v1074_v23  ;;  %vm397_vm2 = vcmp.eq.s32.totalorder %v1088_v27, %v1081_v26  ;;  %v56_v27 = vadd.s32 120, %v1008_v2 }
  0x4d   :  { %v780_v33 = vsel %vm432_vm5, 1.0, %v956_v1  ;;  %vm141_vm7 = vmor %vm69_vm0, %vm109_vm1  ;;  %vm327_vm0 = vcmp.eq.s32.totalorder %v1093_v28, %v1074_v23 }
  0x4e   :  { %v811_v34 = vpack.c.bf16 %v780_v33, %v778_v32  ;;  %vm143_vm9 = vmor %vm71_vm3, %vm111_vm4  ;;  %vm399_vm4 = vcmp.eq.s32.totalorder %v1093_v28, %v1081_v26  ;;  %v525_v32 = vld [vmem:[#allocation5 + $0x20] sm:$0xff] }
  0x4f   :  { %vm213_vm11 = vmor %vm141_vm7, %vm181_vm6  ;;  %vm74_vm6 = vcmp.eq.s32.totalorder %v1146_v35, %v1019_v11  ;;  %vm114_vm7 = vcmp.eq.s32.totalorder %v1146_v35, %v1021_v12  ;;  %v529_v33 = vld [vmem:[#allocation5 + $0x40] sm:$0xff] }
  0x50   :  { %812 = vmatprep.subr.bf16.mxu0 %v811_v34  ;;  %840 = vmatprep.subr.bf16.mxu1 %v811_v34  ;;  %vm215_vm13 = vmor %vm143_vm9, %vm183_vm8  ;;  %vm76_vm9 = vcmp.eq.s32.totalorder %v1151_v36, %v1019_v11 }
  0x51   :  { %vm285_vm15 = vmor %vm213_vm11, %vm253_vm10  ;;  %vm116_vm10 = vcmp.eq.s32.totalorder %v1151_v36, %v1021_v12 }
  0x52   :  { %vm287_vm1 = vmor %vm215_vm13, %vm255_vm12  ;;  %vm186_vm12 = vcmp.eq.s32.totalorder %v1146_v35, %v1023_v13 }
  0x53   :  { %vm357_vm3 = vmor %vm285_vm15, %vm325_vm14  ;;  %vm188_vm14 = vcmp.eq.s32.totalorder %v1151_v36, %v1023_v13 }
  0x54   :  { %vm359_vm5 = vmor %vm287_vm1, %vm327_vm0  ;;  %vm258_vm0 = vcmp.eq.s32.totalorder %v1146_v35, %v1025_v14 }
  0x55   :  { %vm429_vm8 = vmor %vm357_vm3, %vm397_vm2  ;;  %vm260_vm2 = vcmp.eq.s32.totalorder %v1151_v36, %v1025_v14 }
  0x56   :  { %vm431_vm11 = vmor %vm359_vm5, %vm399_vm4  ;;  %v777_v37 = vsel %vm429_vm8, 1.0, %v956_v1  ;;  %vm330_vm4 = vcmp.eq.s32.totalorder %v1146_v35, %v1027_v15  ;;  %vm402_vm8 = vcmp.eq.s32.totalorder %v1146_v35, %v1043_v17 }
  0x57   :  { %v779_v38 = vsel %vm431_vm11, 1.0, %v956_v1  ;;  %vm146_vm13 = vmor %vm74_vm6, %vm114_vm7  ;;  %vm332_vm6 = vcmp.eq.s32.totalorder %v1151_v36, %v1027_v15 }
  0x58   :  { %v813_v39 = vpack.c.bf16 %v779_v38, %v777_v37  ;;  %vm148_vm15 = vmor %vm76_vm9, %vm116_vm10  ;;  %vm404_vm10 = vcmp.eq.s32.totalorder %v1151_v36, %v1043_v17 }
  0x59   :  { %vm218_vm1 = vmor %vm146_vm13, %vm186_vm12  ;;  %vm73_vm12 = vcmp.eq.s32.totalorder %v1146_v35, %v1049_v18  ;;  %vm113_vm13 = vcmp.eq.s32.totalorder %v1146_v35, %v1051_v19 }
  0x5a   :  { %814 = vmatpush1.bf16.msra.mxu0 %v813_v39  ;;  %848 = vmatpush1.bf16.msra.mxu1 %v813_v39  ;;  %vm220_vm3 = vmor %vm148_vm15, %vm188_vm14  ;;  %vm75_vm15 = vcmp.eq.s32.totalorder %v1151_v36, %v1049_v18 }
  0x5b   :  { %vm290_vm5 = vmor %vm218_vm1, %vm258_vm0  ;;  %vm115_vm0 = vcmp.eq.s32.totalorder %v1151_v36, %v1051_v19 }
  0x5c   :  { %vm292_vm7 = vmor %vm220_vm3, %vm260_vm2  ;;  %vm185_vm2 = vcmp.eq.s32.totalorder %v1146_v35, %v1057_v20 }
  0x5d   :  { %vm362_vm9 = vmor %vm290_vm5, %vm330_vm4  ;;  %vm187_vm4 = vcmp.eq.s32.totalorder %v1151_v36, %v1057_v20 }
  0x5e   :  { %vm364_vm11 = vmor %vm292_vm7, %vm332_vm6  ;;  %vm257_vm6 = vcmp.eq.s32.totalorder %v1146_v35, %v1065_v21 }
  0x5f   :  { %vm434_vm14 = vmor %vm362_vm9, %vm402_vm8  ;;  %vm259_vm8 = vcmp.eq.s32.totalorder %v1151_v36, %v1065_v21 }
  0x60   :  { %vm436_vm1 = vmor %vm364_vm11, %vm404_vm10  ;;  %v782_v40 = vsel %vm434_vm14, 1.0, %v956_v1  ;;  %vm329_vm10 = vcmp.eq.s32.totalorder %v1146_v35, %v1074_v23  ;;  %vm401_vm14 = vcmp.eq.s32.totalorder %v1146_v35, %v1081_v26 }
  0x61   :  { %v784_v41 = vsel %vm436_vm1, 1.0, %v956_v1  ;;  %vm145_vm3 = vmor %vm73_vm12, %vm113_vm13  ;;  %vm331_vm12 = vcmp.eq.s32.totalorder %v1151_v36, %v1074_v23 }
  0x62   :  { %v815_v42 = vpack.c.bf16 %v784_v41, %v782_v40  ;;  %vm147_vm5 = vmor %vm75_vm15, %vm115_vm0  ;;  %vm403_vm0 = vcmp.eq.s32.totalorder %v1151_v36, %v1081_v26 }
  0x63   :  { %vm217_vm7 = vmor %vm145_vm3, %vm185_vm2  ;;  %vm78_vm2 = vcmp.eq.s32.totalorder %v1204_v43, %v1019_v11  ;;  %vm118_vm3 = vcmp.eq.s32.totalorder %v1204_v43, %v1021_v12 }
  0x64   :  { %816 = vmatprep.subr.bf16.mxu0 %v815_v42  ;;  %841 = vmatprep.subr.bf16.mxu1 %v815_v42  ;;  %vm219_vm9 = vmor %vm147_vm5, %vm187_vm4  ;;  %vm80_vm5 = vcmp.eq.s32.totalorder %v1209_v44, %v1019_v11 }
  0x65   :  { %vm289_vm11 = vmor %vm217_vm7, %vm257_vm6  ;;  %vm120_vm6 = vcmp.eq.s32.totalorder %v1209_v44, %v1021_v12 }
  0x66   :  { %vm291_vm13 = vmor %vm219_vm9, %vm259_vm8  ;;  %vm190_vm8 = vcmp.eq.s32.totalorder %v1204_v43, %v1023_v13 }
  0x67   :  { %vm361_vm15 = vmor %vm289_vm11, %vm329_vm10  ;;  %vm192_vm10 = vcmp.eq.s32.totalorder %v1209_v44, %v1023_v13 }
  0x68   :  { %vm363_vm1 = vmor %vm291_vm13, %vm331_vm12  ;;  %vm262_vm12 = vcmp.eq.s32.totalorder %v1204_v43, %v1025_v14 }
  0x69   :  { %vm433_vm4 = vmor %vm361_vm15, %vm401_vm14  ;;  %vm264_vm14 = vcmp.eq.s32.totalorder %v1209_v44, %v1025_v14 }
  0x6a   :  { %vm435_vm7 = vmor %vm363_vm1, %vm403_vm0  ;;  %v781_v45 = vsel %vm433_vm4, 1.0, %v956_v1  ;;  %vm334_vm0 = vcmp.eq.s32.totalorder %v1204_v43, %v1027_v15  ;;  %vm406_vm4 = vcmp.eq.s32.totalorder %v1204_v43, %v1043_v17 }
  0x6b   :  { %v783_v46 = vsel %vm435_vm7, 1.0, %v956_v1  ;;  %vm150_vm9 = vmor %vm78_vm2, %vm118_vm3  ;;  %vm336_vm2 = vcmp.eq.s32.totalorder %v1209_v44, %v1027_v15 }
  0x6c   :  { %v817_v47 = vpack.c.bf16 %v783_v46, %v781_v45  ;;  %vm152_vm11 = vmor %vm80_vm5, %vm120_vm6  ;;  %vm408_vm6 = vcmp.eq.s32.totalorder %v1209_v44, %v1043_v17 }
  0x6d   :  { %vm222_vm13 = vmor %vm150_vm9, %vm190_vm8  ;;  %vm77_vm8 = vcmp.eq.s32.totalorder %v1204_v43, %v1049_v18  ;;  %vm117_vm9 = vcmp.eq.s32.totalorder %v1204_v43, %v1051_v19 }
  0x6e   :  { %818 = vmatpush1.bf16.msra.mxu0 %v817_v47  ;;  %849 = vmatpush1.bf16.msra.mxu1 %v817_v47  ;;  %vm224_vm15 = vmor %vm152_vm11, %vm192_vm10  ;;  %vm79_vm11 = vcmp.eq.s32.totalorder %v1209_v44, %v1049_v18 }
  0x6f   :  { %vm294_vm1 = vmor %vm222_vm13, %vm262_vm12  ;;  %vm119_vm12 = vcmp.eq.s32.totalorder %v1209_v44, %v1051_v19 }
  0x70   :  { %vm296_vm3 = vmor %vm224_vm15, %vm264_vm14  ;;  %vm189_vm14 = vcmp.eq.s32.totalorder %v1204_v43, %v1057_v20 }
  0x71   :  { %vm366_vm5 = vmor %vm294_vm1, %vm334_vm0  ;;  %vm191_vm0 = vcmp.eq.s32.totalorder %v1209_v44, %v1057_v20 }
  0x72   :  { %vm368_vm7 = vmor %vm296_vm3, %vm336_vm2  ;;  %vm261_vm2 = vcmp.eq.s32.totalorder %v1204_v43, %v1065_v21 }
  0x73   :  { %vm438_vm10 = vmor %vm366_vm5, %vm406_vm4  ;;  %vm263_vm4 = vcmp.eq.s32.totalorder %v1209_v44, %v1065_v21 }
  0x74   :  { %vm440_vm13 = vmor %vm368_vm7, %vm408_vm6  ;;  %v786_v48 = vsel %vm438_vm10, 1.0, %v956_v1  ;;  %vm333_vm6 = vcmp.eq.s32.totalorder %v1204_v43, %v1074_v23  ;;  %vm405_vm10 = vcmp.eq.s32.totalorder %v1204_v43, %v1081_v26 }
  0x75   :  { %v788_v49 = vsel %vm440_vm13, 1.0, %v956_v1  ;;  %vm149_vm15 = vmor %vm77_vm8, %vm117_vm9  ;;  %vm335_vm8 = vcmp.eq.s32.totalorder %v1209_v44, %v1074_v23 }
  0x76   :  { %v819_v50 = vpack.c.bf16 %v788_v49, %v786_v48  ;;  %vm151_vm1 = vmor %vm79_vm11, %vm119_vm12  ;;  %vm407_vm12 = vcmp.eq.s32.totalorder %v1209_v44, %v1081_v26 }
  0x77   :  { %vm221_vm3 = vmor %vm149_vm15, %vm189_vm14  ;;  %vm82_vm14 = vcmp.eq.s32.totalorder %v1262_v51, %v1019_v11  ;;  %vm122_vm15 = vcmp.eq.s32.totalorder %v1262_v51, %v1021_v12 }
  0x78   :  { %820 = vmatprep.subr.bf16.mxu0 %v819_v50  ;;  %842 = vmatprep.subr.bf16.mxu1 %v819_v50  ;;  %vm223_vm5 = vmor %vm151_vm1, %vm191_vm0  ;;  %vm84_vm1 = vcmp.eq.s32.totalorder %v1267_v52, %v1019_v11 }
  0x79   :  { %vm293_vm7 = vmor %vm221_vm3, %vm261_vm2  ;;  %vm124_vm2 = vcmp.eq.s32.totalorder %v1267_v52, %v1021_v12 }
  0x7a   :  { %vm295_vm9 = vmor %vm223_vm5, %vm263_vm4  ;;  %vm194_vm4 = vcmp.eq.s32.totalorder %v1262_v51, %v1023_v13 }
  0x7b   :  { %vm365_vm11 = vmor %vm293_vm7, %vm333_vm6  ;;  %vm196_vm6 = vcmp.eq.s32.totalorder %v1267_v52, %v1023_v13 }
  0x7c   :  { %vm367_vm13 = vmor %vm295_vm9, %vm335_vm8  ;;  %vm266_vm8 = vcmp.eq.s32.totalorder %v1262_v51, %v1025_v14 }
  0x7d   :  { %vm437_vm0 = vmor %vm365_vm11, %vm405_vm10  ;;  %vm268_vm10 = vcmp.eq.s32.totalorder %v1267_v52, %v1025_v14 }
  0x7e   :  { %vm439_vm3 = vmor %vm367_vm13, %vm407_vm12  ;;  %v785_v53 = vsel %vm437_vm0, 1.0, %v956_v1  ;;  %vm338_vm12 = vcmp.eq.s32.totalorder %v1262_v51, %v1027_v15  ;;  %vm410_vm0 = vcmp.eq.s32.totalorder %v1262_v51, %v1043_v17 }
  0x7f   :  { %v787_v54 = vsel %vm439_vm3, 1.0, %v956_v1  ;;  %vm154_vm5 = vmor %vm82_vm14, %vm122_vm15  ;;  %vm340_vm14 = vcmp.eq.s32.totalorder %v1267_v52, %v1027_v15 }
  0x80   :  { %v821_v55 = vpack.c.bf16 %v787_v54, %v785_v53  ;;  %vm156_vm7 = vmor %vm84_vm1, %vm124_vm2  ;;  %vm412_vm2 = vcmp.eq.s32.totalorder %v1267_v52, %v1043_v17 }
  0x81   :  { %vm226_vm9 = vmor %vm154_vm5, %vm194_vm4  ;;  %vm81_vm4 = vcmp.eq.s32.totalorder %v1262_v51, %v1049_v18  ;;  %vm121_vm5 = vcmp.eq.s32.totalorder %v1262_v51, %v1051_v19 }
  0x82   :  { %822 = vmatpush1.bf16.msra.mxu0 %v821_v55  ;;  %850 = vmatpush1.bf16.msra.mxu1 %v821_v55  ;;  %vm228_vm11 = vmor %vm156_vm7, %vm196_vm6  ;;  %vm83_vm7 = vcmp.eq.s32.totalorder %v1267_v52, %v1049_v18 }
  0x83   :  { %vm298_vm13 = vmor %vm226_vm9, %vm266_vm8  ;;  %vm123_vm8 = vcmp.eq.s32.totalorder %v1267_v52, %v1051_v19 }
  0x84   :  { %vm300_vm15 = vmor %vm228_vm11, %vm268_vm10  ;;  %vm193_vm10 = vcmp.eq.s32.totalorder %v1262_v51, %v1057_v20 }
  0x85   :  { %vm370_vm1 = vmor %vm298_vm13, %vm338_vm12  ;;  %vm195_vm12 = vcmp.eq.s32.totalorder %v1267_v52, %v1057_v20 }
  0x86   :  { %vm372_vm3 = vmor %vm300_vm15, %vm340_vm14  ;;  %vm265_vm14 = vcmp.eq.s32.totalorder %v1262_v51, %v1065_v21 }
  0x87   :  { %vm442_vm6 = vmor %vm370_vm1, %vm410_vm0  ;;  %vm267_vm0 = vcmp.eq.s32.totalorder %v1267_v52, %v1065_v21 }
  0x88   :  { %vm444_vm9 = vmor %vm372_vm3, %vm412_vm2  ;;  %v790_v56 = vsel %vm442_vm6, 1.0, %v956_v1  ;;  %vm337_vm2 = vcmp.eq.s32.totalorder %v1262_v51, %v1074_v23  ;;  %vm409_vm6 = vcmp.eq.s32.totalorder %v1262_v51, %v1081_v26 }
  0x89   :  { %v792_v57 = vsel %vm444_vm9, 1.0, %v956_v1  ;;  %vm153_vm11 = vmor %vm81_vm4, %vm121_vm5  ;;  %vm339_vm4 = vcmp.eq.s32.totalorder %v1267_v52, %v1074_v23 }
  0x8a   :  { %v823_v58 = vpack.c.bf16 %v792_v57, %v790_v56  ;;  %vm155_vm13 = vmor %vm83_vm7, %vm123_vm8  ;;  %vm411_vm8 = vcmp.eq.s32.totalorder %v1267_v52, %v1081_v26 }
  0x8b   :  { %vm225_vm15 = vmor %vm153_vm11, %vm193_vm10  ;;  %vm86_vm10 = vcmp.eq.s32.totalorder %v1320_v59, %v1019_v11  ;;  %vm126_vm11 = vcmp.eq.s32.totalorder %v1320_v59, %v1021_v12 }
  0x8c   :  { %824 = vmatprep.subr.bf16.mxu0 %v823_v58  ;;  %843 = vmatprep.subr.bf16.mxu1 %v823_v58  ;;  %vm227_vm1 = vmor %vm155_vm13, %vm195_vm12  ;;  %vm88_vm13 = vcmp.eq.s32.totalorder %v1325_v60, %v1019_v11 }
  0x8d   :  { %vm297_vm3 = vmor %vm225_vm15, %vm265_vm14  ;;  %vm128_vm14 = vcmp.eq.s32.totalorder %v1325_v60, %v1021_v12 }
  0x8e   :  { %vm299_vm5 = vmor %vm227_vm1, %vm267_vm0  ;;  %vm198_vm0 = vcmp.eq.s32.totalorder %v1320_v59, %v1023_v13 }
  0x8f   :  { %vm369_vm7 = vmor %vm297_vm3, %vm337_vm2  ;;  %vm200_vm2 = vcmp.eq.s32.totalorder %v1325_v60, %v1023_v13 }
  0x90   :  { %vm371_vm9 = vmor %vm299_vm5, %vm339_vm4  ;;  %vm270_vm4 = vcmp.eq.s32.totalorder %v1320_v59, %v1025_v14 }
  0x91   :  { %vm441_vm12 = vmor %vm369_vm7, %vm409_vm6  ;;  %vm272_vm6 = vcmp.eq.s32.totalorder %v1325_v60, %v1025_v14 }
  0x92   :  { %vm443_vm15 = vmor %vm371_vm9, %vm411_vm8  ;;  %v789_v61 = vsel %vm441_vm12, 1.0, %v956_v1  ;;  %vm342_vm8 = vcmp.eq.s32.totalorder %v1320_v59, %v1027_v15  ;;  %vm414_vm12 = vcmp.eq.s32.totalorder %v1320_v59, %v1043_v17 }
  0x93   :  { %v791_v62 = vsel %vm443_vm15, 1.0, %v956_v1  ;;  %vm158_vm1 = vmor %vm86_vm10, %vm126_vm11  ;;  %vm344_vm10 = vcmp.eq.s32.totalorder %v1325_v60, %v1027_v15 }
  0x94   :  { %v825_v63 = vpack.c.bf16 %v791_v62, %v789_v61  ;;  %vm160_vm3 = vmor %vm88_vm13, %vm128_vm14  ;;  %vm416_vm14 = vcmp.eq.s32.totalorder %v1325_v60, %v1043_v17 }
  0x95   :  { %vm230_vm5 = vmor %vm158_vm1, %vm198_vm0  ;;  %vm85_vm0 = vcmp.eq.s32.totalorder %v1320_v59, %v1049_v18  ;;  %vm125_vm1 = vcmp.eq.s32.totalorder %v1320_v59, %v1051_v19 }
  0x96   :  { %826 = vmatpush1.bf16.msra.mxu0 %v825_v63  ;;  %851 = vmatpush1.bf16.msra.mxu1 %v825_v63  ;;  %vm232_vm7 = vmor %vm160_vm3, %vm200_vm2  ;;  %vm87_vm3 = vcmp.eq.s32.totalorder %v1325_v60, %v1049_v18 }
  0x97   :  { %vm302_vm9 = vmor %vm230_vm5, %vm270_vm4  ;;  %vm127_vm4 = vcmp.eq.s32.totalorder %v1325_v60, %v1051_v19 }
  0x98   :  { %vm304_vm11 = vmor %vm232_vm7, %vm272_vm6  ;;  %vm197_vm6 = vcmp.eq.s32.totalorder %v1320_v59, %v1057_v20 }
  0x99   :  { %vm374_vm13 = vmor %vm302_vm9, %vm342_vm8  ;;  %vm199_vm8 = vcmp.eq.s32.totalorder %v1325_v60, %v1057_v20 }
  0x9a   :  { %vm376_vm15 = vmor %vm304_vm11, %vm344_vm10  ;;  %vm269_vm10 = vcmp.eq.s32.totalorder %v1320_v59, %v1065_v21 }
  0x9b   :  { %vm446_vm2 = vmor %vm374_vm13, %vm414_vm12  ;;  %vm271_vm12 = vcmp.eq.s32.totalorder %v1325_v60, %v1065_v21 }
  0x9c   :  { %vm448_vm5 = vmor %vm376_vm15, %vm416_vm14  ;;  %v794_v3 = vsel %vm446_vm2, 1.0, %v956_v1  ;;  %vm341_vm14 = vcmp.eq.s32.totalorder %v1320_v59, %v1074_v23  ;;  %vm413_vm2 = vcmp.eq.s32.totalorder %v1320_v59, %v1081_v26 }
  0x9d   :  { %v796_v4 = vsel %vm448_vm5, 1.0, %v956_v1  ;;  %vm157_vm7 = vmor %vm85_vm0, %vm125_vm1  ;;  %vm343_vm0 = vcmp.eq.s32.totalorder %v1325_v60, %v1074_v23 }
  0x9e   :  { %v827_v5 = vpack.c.bf16 %v796_v4, %v794_v3  ;;  %vm159_vm9 = vmor %vm87_vm3, %vm127_vm4  ;;  %vm415_vm4 = vcmp.eq.s32.totalorder %v1325_v60, %v1081_v26 }
  0x9f   :  { %vm229_vm11 = vmor %vm157_vm7, %vm197_vm6  ;;  %vm90_vm6 = vcmp.eq.s32.totalorder %v1378_v6, %v1019_v11  ;;  %vm130_vm7 = vcmp.eq.s32.totalorder %v1378_v6, %v1021_v12 }
  0xa0   :  { %828 = vmatprep.subr.bf16.mxu0 %v827_v5  ;;  %844 = vmatprep.subr.bf16.mxu1 %v827_v5  ;;  %vm231_vm13 = vmor %vm159_vm9, %vm199_vm8  ;;  %vm92_vm9 = vcmp.eq.s32.totalorder %v1383_v7, %v1019_v11 }
  0xa1   :  { %vm301_vm15 = vmor %vm229_vm11, %vm269_vm10  ;;  %vm132_vm10 = vcmp.eq.s32.totalorder %v1383_v7, %v1021_v12 }
  0xa2   :  { %vm303_vm1 = vmor %vm231_vm13, %vm271_vm12  ;;  %vm202_vm12 = vcmp.eq.s32.totalorder %v1378_v6, %v1023_v13 }
  0xa3   :  { %vm373_vm3 = vmor %vm301_vm15, %vm341_vm14  ;;  %vm204_vm14 = vcmp.eq.s32.totalorder %v1383_v7, %v1023_v13 }
  0xa4   :  { %vm375_vm5 = vmor %vm303_vm1, %vm343_vm0  ;;  %vm274_vm0 = vcmp.eq.s32.totalorder %v1378_v6, %v1025_v14 }
  0xa5   :  { %vm445_vm8 = vmor %vm373_vm3, %vm413_vm2  ;;  %vm276_vm2 = vcmp.eq.s32.totalorder %v1383_v7, %v1025_v14 }
  0xa6   :  { %vm447_vm11 = vmor %vm375_vm5, %vm415_vm4  ;;  %v793_v8 = vsel %vm445_vm8, 1.0, %v956_v1  ;;  %vm346_vm4 = vcmp.eq.s32.totalorder %v1378_v6, %v1027_v15  ;;  %vm418_vm8 = vcmp.eq.s32.totalorder %v1378_v6, %v1043_v17 }
  0xa7   :  { %v795_v9 = vsel %vm447_vm11, 1.0, %v956_v1  ;;  %vm162_vm13 = vmor %vm90_vm6, %vm130_vm7  ;;  %vm348_vm6 = vcmp.eq.s32.totalorder %v1383_v7, %v1027_v15 }
  0xa8   :  { %v829_v10 = vpack.c.bf16 %v795_v9, %v793_v8  ;;  %vm164_vm15 = vmor %vm92_vm9, %vm132_vm10  ;;  %vm420_vm10 = vcmp.eq.s32.totalorder %v1383_v7, %v1043_v17 }
  0xa9   :  { %vm234_vm1 = vmor %vm162_vm13, %vm202_vm12  ;;  %vm89_vm12 = vcmp.eq.s32.totalorder %v1378_v6, %v1049_v18  ;;  %vm129_vm13 = vcmp.eq.s32.totalorder %v1378_v6, %v1051_v19 }
  0xaa   :  { %830 = vmatpush1.bf16.msra.mxu0 %v829_v10  ;;  %852 = vmatpush1.bf16.msra.mxu1 %v829_v10  ;;  %vm236_vm3 = vmor %vm164_vm15, %vm204_vm14  ;;  %vm91_vm15 = vcmp.eq.s32.totalorder %v1383_v7, %v1049_v18 }
  0xab   :  { %vm306_vm5 = vmor %vm234_vm1, %vm274_vm0  ;;  %vm131_vm0 = vcmp.eq.s32.totalorder %v1383_v7, %v1051_v19 }
  0xac   :  { %vm308_vm7 = vmor %vm236_vm3, %vm276_vm2  ;;  %vm201_vm2 = vcmp.eq.s32.totalorder %v1378_v6, %v1057_v20 }
  0xad   :  { %vm378_vm9 = vmor %vm306_vm5, %vm346_vm4  ;;  %vm203_vm4 = vcmp.eq.s32.totalorder %v1383_v7, %v1057_v20 }
  0xae   :  { %vm380_vm11 = vmor %vm308_vm7, %vm348_vm6  ;;  %vm273_vm6 = vcmp.eq.s32.totalorder %v1378_v6, %v1065_v21 }
  0xaf   :  { %vm450_vm14 = vmor %vm378_vm9, %vm418_vm8  ;;  %vm275_vm8 = vcmp.eq.s32.totalorder %v1383_v7, %v1065_v21 }
  0xb0   :  { %vm452_vm1 = vmor %vm380_vm11, %vm420_vm10  ;;  %v798_v16 = vsel %vm450_vm14, 1.0, %v956_v1  ;;  %vm345_vm10 = vcmp.eq.s32.totalorder %v1378_v6, %v1074_v23  ;;  %vm417_vm14 = vcmp.eq.s32.totalorder %v1378_v6, %v1081_v26 }
  0xb1   :  { %v800_v22 = vsel %vm452_vm1, 1.0, %v956_v1  ;;  %vm161_vm3 = vmor %vm89_vm12, %vm129_vm13  ;;  %vm347_vm12 = vcmp.eq.s32.totalorder %v1383_v7, %v1074_v23 }
  0xb2   :  { %v831_v24 = vpack.c.bf16 %v800_v22, %v798_v16  ;;  %vm163_vm5 = vmor %vm91_vm15, %vm131_vm0  ;;  %vm419_vm0 = vcmp.eq.s32.totalorder %v1383_v7, %v1081_v26 }
  0xb3   :  { %vm233_vm7 = vmor %vm161_vm3, %vm201_vm2  ;;  %vm94_vm2 = vcmp.eq.s32.totalorder %v1436_v25, %v1019_v11  ;;  %vm134_vm3 = vcmp.eq.s32.totalorder %v1436_v25, %v1021_v12 }
  0xb4   :  { %832 = vmatprep.subr.bf16.mxu0 %v831_v24  ;;  %845 = vmatprep.subr.bf16.mxu1 %v831_v24  ;;  %vm235_vm9 = vmor %vm163_vm5, %vm203_vm4  ;;  %vm96_vm5 = vcmp.eq.s32.totalorder %v56_v27, %v1019_v11 }
  0xb5   :  { %vm305_vm11 = vmor %vm233_vm7, %vm273_vm6  ;;  %vm136_vm6 = vcmp.eq.s32.totalorder %v56_v27, %v1021_v12 }
  0xb6   :  { %vm307_vm13 = vmor %vm235_vm9, %vm275_vm8  ;;  %vm206_vm8 = vcmp.eq.s32.totalorder %v1436_v25, %v1023_v13 }
  0xb7   :  { %vm377_vm15 = vmor %vm305_vm11, %vm345_vm10  ;;  %vm208_vm10 = vcmp.eq.s32.totalorder %v56_v27, %v1023_v13 }
  0xb8   :  { %vm379_vm1 = vmor %vm307_vm13, %vm347_vm12  ;;  %vm278_vm12 = vcmp.eq.s32.totalorder %v1436_v25, %v1025_v14 }
  0xb9   :  { %vm449_vm4 = vmor %vm377_vm15, %vm417_vm14  ;;  %vm280_vm14 = vcmp.eq.s32.totalorder %v56_v27, %v1025_v14 }
  0xba   :  { %vm451_vm7 = vmor %vm379_vm1, %vm419_vm0  ;;  %v797_v28 = vsel %vm449_vm4, 1.0, %v956_v1  ;;  %vm350_vm0 = vcmp.eq.s32.totalorder %v1436_v25, %v1027_v15  ;;  %vm352_vm4 = vcmp.eq.s32.totalorder %v56_v27, %v1027_v15 }
  0xbb   :  { %v799_v29 = vsel %vm451_vm7, 1.0, %v956_v1  ;;  %vm166_vm9 = vmor %vm94_vm2, %vm134_vm3  ;;  %vm422_vm3 = vcmp.eq.s32.totalorder %v1436_v25, %v1043_v17 }
  0xbc   :  { %v833_v30 = vpack.c.bf16 %v799_v29, %v797_v28  ;;  %vm168_vm11 = vmor %vm96_vm5, %vm136_vm6  ;;  %vm424_vm6 = vcmp.eq.s32.totalorder %v56_v27, %v1043_v17 }
  0xbd   :  { %vm238_vm13 = vmor %vm166_vm9, %vm206_vm8  ;;  %vm93_vm8 = vcmp.eq.s32.totalorder %v1436_v25, %v1049_v18  ;;  %vm133_vm9 = vcmp.eq.s32.totalorder %v1436_v25, %v1051_v19 }
  0xbe   :  { %834 = vmatpush1.bf16.msra.mxu0 %v833_v30  ;;  %853 = vmatpush1.bf16.msra.mxu1 %v833_v30  ;;  %vm240_vm15 = vmor %vm168_vm11, %vm208_vm10  ;;  %vm95_vm11 = vcmp.eq.s32.totalorder %v56_v27, %v1049_v18  ;;  %v521_v18 = vld [vmem:[#allocation5] sm:$0xff] }
  0xbf   :  { %vm310_vm1 = vmor %vm238_vm13, %vm278_vm12  ;;  %vm135_vm12 = vcmp.eq.s32.totalorder %v56_v27, %v1051_v19  ;;  %v526_v19 = vld [vmem:[#allocation5 + $0x28] sm:$0xff] }
  0xc0   :  { %vm312_vm2 = vmor %vm240_vm15, %vm280_vm14  ;;  %vm205_vm14 = vcmp.eq.s32.totalorder %v1436_v25, %v1057_v20 }
  0xc1   :  { %vm382_vm5 = vmor %vm310_vm1, %vm350_vm0  ;;  %vm207_vm0 = vcmp.eq.s32.totalorder %v56_v27, %v1057_v20  ;;  %v522_v20 = vld [vmem:[#allocation5 + $0x8] sm:$0xff] }
  0xc2   :  { %vm384_vm7 = vmor %vm312_vm2, %vm352_vm4  ;;  %vm277_vm4 = vcmp.eq.s32.totalorder %v1436_v25, %v1065_v21 }
  0xc3   :  { %vm454_vm10 = vmor %vm382_vm5, %vm422_vm3  ;;  %vm279_vm3 = vcmp.eq.s32.totalorder %v56_v27, %v1065_v21  ;;  %v523_v21 = vld [vmem:[#allocation5 + $0x10] sm:$0xff] }
  0xc4   :  { %vm456_vm13 = vmor %vm384_vm7, %vm424_vm6  ;;  %v802_v11 = vsel %vm454_vm10, 1.0, %v956_v1  ;;  %vm349_vm6 = vcmp.eq.s32.totalorder %v1436_v25, %v1074_v23  ;;  %vm351_vm10 = vcmp.eq.s32.totalorder %v56_v27, %v1074_v23  ;;  %v527_v23 = vld [vmem:[#allocation5 + $0x30] sm:$0xff] }
  0xc5   :  { %v804_v12 = vsel %vm456_vm13, 1.0, %v956_v1  ;;  %vm165_vm15 = vmor %vm93_vm8, %vm133_vm9  ;;  %vm421_vm9 = vcmp.eq.s32.totalorder %v1436_v25, %v1081_v26 }
  0xc6   :  { %v835_v13 = vpack.c.bf16 %v804_v12, %v802_v11  ;;  %vm167_vm1 = vmor %vm95_vm11, %vm135_vm12  ;;  %vm423_vm12 = vcmp.eq.s32.totalorder %v56_v27, %v1081_v26  ;;  %v524_v26 = vld [vmem:[#allocation5 + $0x18] sm:$0xff]  ;;  %v957_v12 = vmov 1966171168  }
  0xc7   :  { %vm237_vm2 = vmor %vm165_vm15, %vm205_vm14 }
  0xc8   :  { %836 = vmatprep.subr.bf16.mxu0 %v835_v13  ;;  %846 = vmatprep.subr.bf16.mxu1 %v835_v13  ;;  %vm239_vm5 = vmor %vm167_vm1, %vm207_vm0  ;;  %v738_v13 = vunpack.c.l.s4 %v957_v12  ;;  %vm754_vm0 = vcmp.lt.s32.totalorder %v40_v0, 256 }
  0xc9   :  { %vm309_vm7 = vmor %vm237_vm2, %vm277_vm4 }
  0xca   :  { %vm311_vm8 = vmor %vm239_vm5, %vm279_vm3 }
  0xcb   :  { %vm381_vm11 = vmor %vm309_vm7, %vm349_vm6 }
  0xcc   :  { %vm383_vm13 = vmor %vm311_vm8, %vm351_vm10 }
  0xcd   :  { %vm453_vm14 = vmor %vm381_vm11, %vm421_vm9 }
  0xce   :  { %vm455_vm15 = vmor %vm383_vm13, %vm423_vm12  ;;  %v801_v14 = vsel %vm453_vm14, 1.0, %v956_v1 }
  0xcf   :  { %v803_v15 = vsel %vm455_vm15, 1.0, %v956_v1 }
  0xd0   :  { %v837_v17 = vpack.c.bf16 %v803_v15, %v801_v14  ;;  %v739_v14 = vunpack.c.0.s8 %v738_v13 }
  0xd2   :  { %838 = vmatpush1.bf16.msra.mxu0 %v837_v17  ;;  %854 = vmatpush1.bf16.msra.mxu1 %v837_v17  ;;  %v742_v17 = vsub.s32 %v739_v14, %v1008_v2 }
  0xd5   :  { %595 = vmatmul.mubr.f32.vlgmr.msra.gmra.mrb[0].mxu0 %v521_v18  ;;  %625 = vmatmul.mubr.f32.vlgmr.msra.gmra.mrb[0].mxu1 %v526_v19 }
  0xd6   :  { %600 = vmatprep.mubr.f32.mxu0 %v956_v1  ;;  %630 = vmatprep.mubr.f32.mxu1 %v956_v1 }
  0xd9   :  { %601 = vmatmul.mubr.f32.gmra.mrb[2].mxu0 %v522_v20 }
  0xda   :  { %606 = vmatprep.mubr.f32.mxu0 %v956_v1 }
  0xdd   :  { %607 = vmatmul.mubr.f32.gmra.mrb[4].mxu0 %v523_v21  ;;  %631 = vmatmul.mubr.f32.gmra.mrb[0].mxu1 %v527_v23 }
  0xde   :  { %612 = vmatprep.mubr.f32.mxu0 %v956_v1  ;;  %636 = vmatprep.mubr.f32.mxu1 %v956_v1 }
  0xe1   :  { %613 = vmatmul.mubr.f32.gmra.mrb[6].mxu0 %v524_v26 }
  0xe2   :  { %618 = vmatprep.mubr.f32.mxu0 %v956_v1 }
  0xe5   :  { %637 = vmatmul.mubr.f32.gmra.mrb[0].mxu1 %v528_v31  ;;  %619 = vmatmul.mubr.f32.gmra.mrb[8].mxu0 %v525_v32 }
  0xe6   :  { %642 = vmatprep.mubr.f32.mxu1 %v956_v1 }
  0xed   :  { %643 = vmatmul.mubr.f32.gmra.mrb[0].mxu1 %v529_v33 }
 0x1a8   :  { %v596_v34 = vpop.f32.mrb[0].mxu0 }
 0x1a9   :  { %v598_v35 = vpop.f32.mrb[1].mxu0  ;;  %v658_v36 = vmul.f32 %v596_v34, %v596_v34 }
 0x1aa   :  { %v659_v37 = vmul.f32 %v598_v35, %v598_v35 }
 0x1ac   :  { %v602_v38 = vpop.f32.mrb[2].mxu0 }
 0x1ad   :  { %v660_v39 = vmul.f32 %v602_v38, %v602_v38  ;;  %v604_v40 = vpop.f32.mrb[3].mxu0 }
 0x1ae   :  { %v661_v41 = vmul.f32 %v604_v40, %v604_v40 }
 0x1af   :  { %v694_v42 = vadd.f32 %v660_v39, %v658_v36 }
 0x1b0   :  { %v708_v43 = vadd.f32 %v661_v41, %v659_v37  ;;  %v608_v44 = vpop.f32.mrb[4].mxu0 }
 0x1b1   :  { %v662_v45 = vmul.f32 %v608_v44, %v608_v44  ;;  %v610_v46 = vpop.f32.mrb[5].mxu0 }
 0x1b2   :  { %v663_v47 = vmul.f32 %v610_v46, %v610_v46 }
 0x1b3   :  { %v695_v48 = vadd.f32 %v694_v42, %v662_v45 }
 0x1b4   :  { %v709_v49 = vadd.f32 %v708_v43, %v663_v47  ;;  %v614_v50 = vpop.f32.mrb[6].mxu0 }
 0x1b5   :  { %v664_v1 = vmul.f32 %v614_v50, %v614_v50  ;;  %v616_v51 = vpop.f32.mrb[7].mxu0 }
 0x1b6   :  { %v665_v52 = vmul.f32 %v616_v51, %v616_v51 }
 0x1b7   :  { %v696_v53 = vadd.f32 %v695_v48, %v664_v1 }
 0x1b8   :  { %v710_v54 = vadd.f32 %v709_v49, %v665_v52  ;;  %v620_v55 = vpop.f32.mrb[8].mxu0 }
 0x1b9   :  { %v622_v56 = vpop.f32.mrb[9].mxu0 }
 0x1c0   :  { %v644_v57 = vpop.f32.mrb[0].mxu1 }
 0x1c1   :  { %v855_v58 = vadd.f32 %v644_v57, %v620_v55  ;;  %v646_v59 = vpop.f32.mrb[1].mxu1 }
 0x1c2   :  { %v857_v60 = vadd.f32 %v646_v59, %v622_v56 }
 0x1c3   :  { %v856_v61 = vadd.f32 %v855_v58, %v696_v53 }
 0x1c4   :  { %v858_v62 = vadd.f32 %v857_v60, %v710_v54 }
 0x1c5   :  { %v702_v63 = vrot.slane %v856_v61, 4 }
 0x1c6   :  { %v716_v3 = vrot.slane %v858_v62, 4 }
 0x1c7   :  { %v703_v4 = vadd.f32 %v856_v61, %v702_v63 }
 0x1c8   :  { %v717_v5 = vadd.f32 %v858_v62, %v716_v3 }
 0x1c9   :  { %v704_v6 = vrot.slane %v703_v4, 2 }
 0x1ca   :  { %v718_v7 = vrot.slane %v717_v5, 2 }
 0x1cb   :  { %v705_v8 = vadd.f32 %v704_v6, %v703_v4 }
 0x1cc   :  { %v719_v9 = vadd.f32 %v718_v7, %v717_v5 }
 0x1cd   :  { %v706_v10 = vrot.slane %v705_v8, 1 }
 0x1ce   :  { %v720_v16 = vrot.slane %v719_v9, 1 }
 0x1cf   :  { %v707_v22 = vadd.f32 %v706_v10, %v705_v8 }
 0x1d0   :  { %v721_v24 = vadd.f32 %v720_v16, %v719_v9 }
 0x1d1   :  { %v805_v25 = vmul.f32 -1.442695, %v707_v22 }
 0x1d2   :  { %v806_v27 = vmul.f32 -1.442695, %v721_v24 }
 0x1d3   :  { %872 = vpow2.f32 %v805_v25 }
 0x1d4   :  { %874 = vpow2.f32 %v806_v27 }
 0x1dd   :  { %v873_v28 = vpop.eup %872 }
 0x1de   :  { %v875_v29 = vpop.eup %874  ;;  %v728_v30 = vadd.f32 1.0, %v873_v28 }
 0x1df   :  { %v729_v11 = vadd.f32 1.0, %v875_v29 }
 0x1e0   :  { %876 = vrcp.f32 %v728_v30 }
 0x1e1   :  { %878 = vrcp.f32 %v729_v11 }
 0x1ea   :  { %v877_v15 = vpop.eup %876 }
 0x1eb   :  { %v879_v18 = vpop.eup %878 }
 0x1ec   :  { %v736_v19 = vcombine.low %v877_v15, %v879_v18 }
 0x1ee   :  { %v743_v20 = vrot.slane %v736_v19, %v742_v17 }
 0x1f0   :  { %v750_v21 = vrot.slane %v743_v20, %v742_v17 }
 0x1f2   :  { %756 = vst.msk [vmem:[#allocation7] sm:$0x3] %vm754_vm0, %v750_v21 }
 0x1f3   :  { %935 = shalt.err (!%p932_p6)
}
 0x1f4   :  { %s936_s10 = scalar_lea.hbm %s1510_s2, 32 }
 0x1f5   :  { %p937_p7 = scmp.ne.s32.totalorder %s1510_s2, %s936_s10  ;;  %p940_p8 = scmp.lt.u32.totalorder %s936_s10, %s1510_s2 }
 0x1f7   :  { %p942_p9 = pnand %p940_p8, %p937_p7 }
 0x1f9   :  { %945 = shalt.err (!%p942_p9)
}
 0x1fa   :  { %766 = dma.vmem_to_hbm [thread:$0]  %s764_s6, 32, %s1510_s2, [#allocation4]  }
 0x1fb   :  { %950 = dma.done.wait [#allocation4], 32  }
 0x1fc   :  { %951 = vsyncadd [#allocation4], 4294967264 }
 0x1fd   :  { %770 = vsyncpa [#allocation3], 1 }
 0x1fe   :  { %771 = vsyncpa [#allocation6], 1 }
 0x1ff   :  { %772 = vsyncpa [#allocation4], 1 }

</bundles_post_ra>
